<compile_context>
chip_gen: v7x
topology: tpu7x:2x2x1
jax: 0.10.0
libtpu: 0.0.40
codegen_flags: <defaults>
</compile_context>

<pallas_src>
import functools

import jax
import jax.numpy as jnp
from jax.experimental import pallas as pl
from jax.experimental.pallas import tpu as pltpu


def _upsample_nearest_kernel(x_ref, r_ref, o_ref, *, scale: int):
    # x_ref: (TM, W), r_ref: (W, W*s) 0/1 selector, o_ref: (TM, W*s*s)
    x = x_ref[...].astype(r_ref.dtype)                                   # no-op for float inputs
    xw = jnp.dot(x, r_ref[...], preferred_element_type=jnp.float32)      # (TM, W*s): xw[m, wo] = x[m, wo//s]
    xw = xw.astype(o_ref.dtype)
    if scale > 1:
        # Row of the (M, s*Wo) output = the W-expanded row tiled s times along lanes;
        # after the (free) wrapper reshape this realizes the H replication.
        o_ref[...] = jnp.concatenate([xw] * scale, axis=-1)
    else:
        o_ref[...] = xw


def upsample_nearest(x: jax.Array, scale_factor: int = 2, mode: str = "nearest") -> jax.Array:
    """Pallas TPU equivalent of UpsampleLayer.forward for NCHW inputs."""
    if mode != "nearest":
        # TODO(synk): only mode='nearest' (the module default) is implemented.
        raise NotImplementedError("Only mode='nearest' is implemented.")

    N, C, H, W = x.shape
    s = int(scale_factor)
    Wo = W * s
    M = N * C * H
    dt = x.dtype
    itemsize = jnp.dtype(dt).itemsize

    # Compute dtype: native float dtype (bf16 stays bf16 on the MXU); integer inputs
    # take an f32 selector path (exact for |x| < 2^24).
    # TODO(synk): a dedicated copy path for integer dtypes would avoid the float round-trip.
    compute_dt = dt if jnp.issubdtype(dt, jnp.floating) else jnp.float32

    # 0/1 column-replication selector, built ONCE in the wrapper (hoisted out of the grid).
    wi = jax.lax.broadcasted_iota(jnp.int32, (W, Wo), 0)
    wo = jax.lax.broadcasted_iota(jnp.int32, (W, Wo), 1)
    r = (wi == wo // s).astype(compute_dt)

    x2 = x.reshape(M, W)  # free contiguous reshape

    # Row-tile sizing: target ~2 MiB output tiles (amortize per-step overhead, stay well
    # under VMEM limits on v5e/v6e/v7x), sublane-aligned; prefer >= 2 grid steps for v7x.
    out_row_bytes = max(1, s * Wo * itemsize)
    tm = max(8, ((2 * 1024 * 1024) // out_row_bytes) // 8 * 8)
    if tm >= M:
        if M >= 64 and M % 16 == 0:
            tm = M // 2          # give v7x's two TensorCores one block each
        else:
            tm = M               # single full-extent block (always a legal block shape)
    grid_m = pl.cdiv(M, tm)

    flops = 2 * M * W * Wo
    bytes_accessed = M * W * itemsize + W * Wo * itemsize + M * s * Wo * itemsize

    out2 = pl.pallas_call(
        functools.partial(_upsample_nearest_kernel, scale=s),
        out_shape=jax.ShapeDtypeStruct((M, s * Wo), dt),
        grid=(grid_m,),
        in_specs=[
            pl.BlockSpec((tm, W), lambda i: (i, 0)),
            pl.BlockSpec((W, Wo), lambda i: (0, 0)),   # constant block: selector stays resident
        ],
        out_specs=pl.BlockSpec((tm, s * Wo), lambda i: (i, 0)),
        compiler_params=pltpu.CompilerParams(dimension_semantics=("parallel",)),
        cost_estimate=pl.CostEstimate(
            flops=int(flops), transcendentals=0, bytes_accessed=int(bytes_accessed)
        ),
    )(x2, r)

    # (M, s*Wo) is bit-identical (contiguous layout) to (N, C, H*s, W*s): free reshape.
    return out2.reshape(N, C, H * s, W * s)


if __name__ == "__main__":
    key = jax.random.PRNGKey(0)
    N, C, H, W = 2, 4, 16, 16
    x = jax.random.normal(key, (N, C, H, W), dtype=jnp.float32)

    y = upsample_nearest(x, scale_factor=2, mode="nearest")
    y = jax.block_until_ready(y)

    # Reference: nearest-neighbor upsample (out[h, w] = in[h // 2, w // 2])
    ref = jnp.repeat(jnp.repeat(x, 2, axis=2), 2, axis=3)

    assert y.shape == (N, C, 2 * H, 2 * W), y.shape
    assert y.dtype == x.dtype, y.dtype
    assert jnp.allclose(y, ref, atol=1e-6, rtol=1e-6), "mismatch vs reference"

    print("KERNEL_OK")
</pallas_src>

<mosaic_0001>
module attributes {stable_mosaic.version = 11 : i64} {
  func.func @_upsample_nearest_kernel(%arg0: i32, %arg1: memref<64x16xf32, #tpu.memory_space<vmem>>, %arg2: memref<16x32xf32, #tpu.memory_space<vmem>>, %arg3: memref<64x64xf32, #tpu.memory_space<vmem>>) attributes {dimension_semantics = [#tpu.dimension_semantics<parallel>], iteration_bounds = array<i64: 2>, scalar_prefetch = 0 : i64, scratch_operands = 0 : i64, tpu.core_type = #tpu.core_type<tc>, window_params = [{transform_indices = @transform_0, window_bounds = array<i64: 64, 16>}, {pipeline_mode = #tpu.pipeline_mode<synchronous>, transform_indices = @transform_1, window_bounds = array<i64: 16, 32>}, {transform_indices = @transform_2, window_bounds = array<i64: 64, 64>}]} {
    %c0 = arith.constant 0 : index
    %c0_0 = arith.constant 0 : index
    %0 = vector.load %arg1[%c0, %c0_0] : memref<64x16xf32, #tpu.memory_space<vmem>>, vector<64x16xf32>
    %c0_1 = arith.constant 0 : index
    %c0_2 = arith.constant 0 : index
    %1 = vector.load %arg2[%c0_1, %c0_2] : memref<16x32xf32, #tpu.memory_space<vmem>>, vector<16x32xf32>
    %cst = arith.constant dense<0.000000e+00> : vector<64x32xf32>
    %2 = tpu.matmul %0, %1, %cst {dimension_numbers = #tpu.dot_dimension_numbers<[1], [0], [0], [1], [0, 0, 1, 1], [], []>} : vector<64x16xf32>, vector<16x32xf32>, vector<64x32xf32> -> vector<64x32xf32>
    %3 = tpu.concatenate %2, %2 in 1 : vector<64x32xf32>, vector<64x32xf32> -> vector<64x64xf32>
    %c0_3 = arith.constant 0 : index
    %c0_4 = arith.constant 0 : index
    %4 = vector.load %arg3[%c0_3, %c0_4] : memref<64x64xf32, #tpu.memory_space<vmem>>, vector<64x64xf32>
    tpu.vector_store %arg3[%c0_3, %c0_4], %3 {strides = array<i32>} : memref<64x64xf32, #tpu.memory_space<vmem>>, vector<64x64xf32>,
    return
  }
  func.func @transform_0(%arg0: i32) -> (i32, i32) {
    %c0_i32 = arith.constant 0 : i32
    %c0_i32_0 = arith.constant 0 : i32
    return %arg0, %c0_i32 : i32, i32
  }
  func.func @transform_1(%arg0: i32) -> (i32, i32) {
    %c0_i32 = arith.constant 0 : i32
    %c0_i32_0 = arith.constant 0 : i32
    %c0_i32_1 = arith.constant 0 : i32
    return %c0_i32, %c0_i32_0 : i32, i32
  }
  func.func @transform_2(%arg0: i32) -> (i32, i32) {
    %c0_i32 = arith.constant 0 : i32
    %c0_i32_0 = arith.constant 0 : i32
    return %arg0, %c0_i32 : i32, i32
  }
}

</mosaic_0001>

<bundles_post_ra>
// kernel: tpu_custom_call.1
= control target key start
LH: loop header
LB: loop body
LE: loop exit
PB: predicated region body
PF: predicated region fallthrough
CT: control target
= control target key end

     0   :  { %s477_s9 = smov 0   ;;  %s531_s0 = inlined_call_operand.vmem [shape: f32[128,16], index: 0, kind: input, shape index: {}]   ;;  %s532_s1 = inlined_call_operand.vmem [shape: f32[16,32], index: 1, kind: input, shape index: {}]   ;;  %s533_s2 = inlined_call_operand.vmem [shape: f32[128,64], index: 2, kind: output, shape index: {}]  }
   0x1 LB: > { %s393_s10 = sadd.s32 4294967295, %s459_s9   ;;  %p397_p0 = scmp.ge.s32.totalorder %s459_s9, 1  ;;  %s459_s9 = sphi %s477_s9, %s12_s9  }
   0x2   : > { %p113_p1 = scmp.lt.s32.totalorder %s459_s9, 3 }
   0x4   : > { %p114_p2 = pnand %p397_p0, %p113_p1 }
   0x5   : > { %v155_v0 = vld [vmem:[%s532_s1] sm:$0xff] (!%p114_p2)  ;;  %v156_v1 = vld [vmem:[%s532_s1 + $0x8] sm:$0xff] (!%p114_p2)  ;;  %s398_s15 = sshll.u32 (!%p114_p2), %s393_s10, 3  ;;  %vm157_vm0 = vcmask (!%p114_p2), 130048   ;;  %s461_s20 = smov (!%p114_p2), 32   ;;  %vm319_vm1 = vcmask (!%p114_p2), 261120  }
   0x6   : > { %117 = sbr.rel (%p114_p2) target bundleno = 360 (0x168), region = 28  ;;  %v438_v2 = vpack.c.bf16 (!%p114_p2), %v156_v1, %v155_v0  ;;  %p136_p3 = scmp.lt.s32.totalorder (!%p114_p2), %s398_s15, 15  ;;  %vm328_vm2 = vcmask (!%p114_p2), 523264  }
   0x8   : > { %439 = vmatprep.subr.bf16.mxu0 (!%p114_p2), %v438_v2  ;;  %442 = vmatprep.subr.bf16.mxu1 (!%p114_p2), %v438_v2 }
   0x9   : > { %441 = vmatpush3.bf16.msra.mxu0 (!%p114_p2), %v438_v2  ;;  %443 = vmatpush3.bf16.msra.mxu1 (!%p114_p2), %v438_v2 }
   0xd   : > { %s535_s15 = smov (!%p136_p3, %s398_s15), 15 }
   0xe   : > { %s399_s16 = sshll.u32 %s535_s15, 3 }
   0xf   : > { %s139_s19 = scalar_lea.vmem %s531_s0, %s399_s16  ;;  %s145_s23 = scalar_lea.vmem %s533_s2, %s399_s16 }
  0x10   : > { %v147_v3 = vld [vmem:[%s139_s19] sm:$0xff]  ;;  %v148_v5 = vld [vmem:[%s139_s19 + $0x8] sm:$0xff]  ;;  %v149_v7 = vld [vmem:[%s139_s19 + $0x10] sm:$0xff] }
  0x11   : > { %v151_v4 = vld [vmem:[%s139_s19 + $0x20] sm:$0xff]  ;;  %426 = vmatprep.mubr.msk.f32.mxu0 %vm157_vm0, %v147_v3  ;;  %v152_v6 = vld [vmem:[%s139_s19 + $0x28] sm:$0xff]  ;;  %v153_v8 = vld [vmem:[%s139_s19 + $0x30] sm:$0xff] }
  0x12   : > { %432 = vmatprep.mubr.msk.f32.mxu1 %vm157_vm0, %v151_v4  ;;  %427 = vmatmul.mubr.msk.f32.vlgmr.msra.gmra.mrb[0].mxu0 %vm157_vm0, %v148_v5  ;;  %v150_v9 = vld [vmem:[%s139_s19 + $0x18] sm:$0xff] }
  0x13   : > { %433 = vmatmul.mubr.msk.f32.vlgmr.msra.gmra.mrb[0].mxu1 %vm157_vm0, %v152_v6  ;;  %429 = vmatprep.mubr.msk.f32.mxu0 %vm157_vm0, %v149_v7  ;;  %v154_v10 = vld [vmem:[%s139_s19 + $0x38] sm:$0xff] }
  0x14   : > { %435 = vmatprep.mubr.msk.f32.mxu1 %vm157_vm0, %v153_v8 }
  0x16   : > { %430 = vmatmul.mubr.msk.f32.gmra.mrb[2].mxu0 %vm157_vm0, %v150_v9 }
  0x17   : > { %436 = vmatmul.mubr.msk.f32.gmra.mrb[2].mxu1 %vm157_vm0, %v154_v10 }
  0xe5   : > { %v428_v11 = vpop.f32.mrb[0].mxu0 }
  0xe6   : > { %v434_v12 = vpop.f32.mrb[0].mxu1  ;;  %297 = vrot.lane.b32.xlu0 %v428_v11, %s461_s20  ;;  %v248_v14 = vpop.f32.mrb[1].mxu0 }
  0xe7   : > { %305 = vrot.lane.b32.xlu1 %v434_v12, %s461_s20  ;;  %v268_v13 = vpop.f32.mrb[1].mxu1 }
  0xe9   : > { %v431_v15 = vpop.f32.mrb[2].mxu0 }
  0xea   : > { %v437_v16 = vpop.f32.mrb[2].mxu1  ;;  %295 = vrot.lane.b32.xlu0 %v248_v14, %s461_s20  ;;  %v258_v17 = vpop.f32.mrb[3].mxu0 }
  0xeb   : > { %301 = vrot.lane.b32.xlu1 %v431_v15, %s461_s20  ;;  %v278_v18 = vpop.f32.mrb[3].mxu1 }
  0xee   : > { %303 = vrot.lane.b32.xlu0 %v268_v13, %s461_s20 }
  0xef   : > { %299 = vrot.lane.b32.xlu1 %v258_v17, %s461_s20 }
  0xf2   : > { %307 = vrot.lane.b32.xlu0 %v278_v18, %s461_s20 }
  0xf3   : > { %309 = vrot.lane.b32.xlu1 %v437_v16, %s461_s20 }
 0x158   : > { %v298_v20 = vpop.permute.xlu0 %297 }
 0x159   : > { %v306_v19 = vpop.permute.xlu1 %305  ;;  %v321_v22 = vsel %vm319_vm1, %v428_v11, %v298_v20 }
 0x15a   : > { %v325_v21 = vsel %vm319_vm1, %v434_v12, %v306_v19  ;;  %330 = vst.msk [vmem:[%s145_s23 + $0x8] sm:$0xff] %vm328_vm2, %v321_v22 }
 0x15b   : > { %334 = vst.msk [vmem:[%s145_s23 + $0x28] sm:$0xff] %vm328_vm2, %v325_v21 }
 0x15c   : > { %v296_v23 = vpop.permute.xlu0 %295 }
 0x15d   : > { %v302_v24 = vpop.permute.xlu1 %301  ;;  %v320_v25 = vsel %vm319_vm1, %v248_v14, %v296_v23 }
 0x15e   : > { %v323_v26 = vsel %vm319_vm1, %v431_v15, %v302_v24  ;;  %329 = vst.msk [vmem:[%s145_s23] sm:$0xff] %vm328_vm2, %v320_v25 }
 0x15f   : > { %332 = vst.msk [vmem:[%s145_s23 + $0x18] sm:$0xff] %vm328_vm2, %v323_v26 }
 0x160   : > { %v304_v27 = vpop.permute.xlu0 %303 }
 0x161   : > { %v300_v28 = vpop.permute.xlu1 %299  ;;  %v324_v29 = vsel %vm319_vm1, %v268_v13, %v304_v27 }
 0x162   : > { %v322_v30 = vsel %vm319_vm1, %v258_v17, %v300_v28  ;;  %333 = vst.msk [vmem:[%s145_s23 + $0x20] sm:$0xff] %vm328_vm2, %v324_v29 }
 0x163   : > { %331 = vst.msk [vmem:[%s145_s23 + $0x10] sm:$0xff] %vm328_vm2, %v322_v30 }
 0x164   : > { %v308_v31 = vpop.permute.xlu0 %307 }
 0x165   : > { %v310_v32 = vpop.permute.xlu1 %309  ;;  %v326_v33 = vsel %vm319_vm1, %v278_v18, %v308_v31 }
 0x166   : > { %v327_v34 = vsel %vm319_vm1, %v437_v16, %v310_v32  ;;  %335 = vst.msk [vmem:[%s145_s23 + $0x30] sm:$0xff] %vm328_vm2, %v326_v33 }
 0x167   : > { %336 = vst.msk [vmem:[%s145_s23 + $0x38] sm:$0xff] %vm328_vm2, %v327_v34 }
 0x168 PF: > { %s12_s9 = sadd.s32 1, %s459_s9  }
 0x169   : > { %p9_p4 = scmp.ge.s32.totalorder %s12_s9, 4  }
 0x16b   :  { %11 = sbr.rel (!%p9_p4) target bundleno = 1 (0x1), region = 58 }

</bundles_post_ra>
